<compile_context>
chip_gen: v5e
topology: v5e:2x2
jax: 0.10.0
libtpu: 0.0.40
codegen_flags: <defaults>
</compile_context>

<pallas_src>
from functools import partial

import jax
import jax.numpy as jnp
from jax.experimental import pallas as pl
from jax.experimental.pallas import tpu as pltpu


def z_kernel(x_ref, w1_ref, w23_ref, b1_ref, b23_ref, *rest, z_dim, is_prior):
    """One fused forward block, everything resident in VMEM.

    Output layout (lane-dense, padded to a multiple of 128 lanes):
        out[:, 0:2Z]  = [mean | logstd]   (single contiguous slab store)
        out[:, 2Z:3Z] = z                 (skipped when is_prior: z == mean)
        out[:, 3Z:]   = pad (never written, never read)
    """
    if is_prior:
        (out_ref,) = rest
        eps_ref = None
    else:
        eps_ref, out_ref = rest

    mxu_dtype = w1_ref.dtype                      # f32, or bf16 on v6e/v7x
    x = x_ref[...].astype(mxu_dtype)

    # hz = tanh(x @ W1 + b1); bias add + tanh stay in f32 (v5e VPU/EUP are f32).
    hz = jnp.tanh(
        jnp.dot(x, w1_ref[...], preferred_element_type=jnp.float32)
        + b1_ref[...]
    )

    # [mean | logstd] = hz @ [W2 | W3] + [b2 | b3]   (one fused MXU pass)
    ml = (
        jnp.dot(hz.astype(mxu_dtype), w23_ref[...],
                preferred_element_type=jnp.float32)
        + b23_ref[...]
    )

    out_dtype = out_ref.dtype
    # One 2Z-wide contiguous store at lane 0 (no re-slicing of ml for writeback).
    out_ref[:, : 2 * z_dim] = ml.astype(out_dtype)

    if not is_prior:
        mean = ml[:, :z_dim]
        logstd = ml[:, z_dim:]
        # stddev = sqrt(exp(logstd)) == exp(0.5*logstd): one EUP transcendental.
        z = mean + jnp.exp(0.5 * logstd) * eps_ref[...]
        out_ref[:, 2 * z_dim: 3 * z_dim] = z.astype(out_dtype)


def z_forward(x, packed, epsilon=None, *, is_prior=False, batch_block=128):
    """Pallas-backed equivalent of Z.forward.

    packed: dict with
        w1  (D_in, Z)        (f32 or bf16)
        w23 (Z, 2*Z) = [W2 | W3]
        b1  (1, Z), b23 (1, 2*Z)   (f32)
    Returns (z, mean, logstd), each (batch, Z) float32.
    """
    batch, in_dim = x.shape
    z_dim = packed["w1"].shape[1]

    # Lane-dense output: pad 3*Z up to a multiple of 128 lanes.
    out_width = pl.cdiv(3 * z_dim, 128) * 128

    # Batch tiling: weights resident across the grid, batch rows sharded and
    # marked "parallel" (uses both v7x TensorCores once batch is nontrivial).
    if batch > batch_block and batch % batch_block == 0:
        bm = batch_block
    else:
        bm = batch
    grid = (batch // bm,)

    def resident(shape):
        return pl.BlockSpec(shape, lambda i: (0, 0))

    in_specs = [
        pl.BlockSpec((bm, in_dim), lambda i: (i, 0)),
        resident((in_dim, z_dim)),
        resident((z_dim, 2 * z_dim)),
        resident((1, z_dim)),
        resident((1, 2 * z_dim)),
    ]
    inputs = [x, packed["w1"], packed["w23"], packed["b1"], packed["b23"]]
    if not is_prior:
        assert epsilon is not None, "epsilon required for the sampling path"
        in_specs.append(pl.BlockSpec((bm, z_dim), lambda i: (i, 0)))
        inputs.append(epsilon)

    out = pl.pallas_call(
        partial(z_kernel, z_dim=z_dim, is_prior=is_prior),
        out_shape=jax.ShapeDtypeStruct((batch, out_width), jnp.float32),
        grid=grid,
        in_specs=in_specs,
        out_specs=pl.BlockSpec((bm, out_width), lambda i: (i, 0)),
        compiler_params=pltpu.CompilerParams(
            dimension_semantics=("parallel",)),
        # NOTE: at realistic (large) z_dim/in_dim on v7x, set vmem_limit_bytes
        # and shrink bm (never the output lane dim) to fit the 64 MiB VMEM.
    )(*inputs)

    # Unpack without three raw lane-slices of the output slab.
    if out_width % z_dim == 0:
        chunks = out.reshape(batch, out_width // z_dim, z_dim)
        mean, logstd = chunks[:, 0], chunks[:, 1]
        z = mean if is_prior else chunks[:, 2]
    else:  # generic fallback
        mean = out[:, :z_dim]
        logstd = out[:, z_dim:2 * z_dim]
        z = mean if is_prior else out[:, 2 * z_dim:3 * z_dim]
    return z, mean, logstd


def init_params(key, input_dim, z_dim):
    """Deterministic synthetic parameter init (matches nn.Linear shapes)."""
    k1, k2, k3, k4, k5, k6 = jax.random.split(key, 6)
    s1 = 1.0 / jnp.sqrt(input_dim)
    s2 = 1.0 / jnp.sqrt(z_dim)
    return {
        "w1": jax.random.uniform(k1, (input_dim, z_dim), jnp.float32, -s1, s1),
        "b1": jax.random.uniform(k2, (1, z_dim), jnp.float32, -s1, s1),
        "w2": jax.random.uniform(k3, (z_dim, z_dim), jnp.float32, -s2, s2),
        "b2": jax.random.uniform(k4, (1, z_dim), jnp.float32, -s2, s2),
        "w3": jax.random.uniform(k5, (z_dim, z_dim), jnp.float32, -s2, s2),
        "b3": jax.random.uniform(k6, (1, z_dim), jnp.float32, -s2, s2),
    }


def pack_params(params, mxu_dtype=jnp.float32):
    """Fuse W2|W3, keep biases as two separate (f32) inputs.

    mxu_dtype=jnp.bfloat16 enables native-bf16 MXU operands on v6e/v7x.
    """
    return {
        "w1": params["w1"].astype(mxu_dtype),
        "w23": jnp.concatenate([params["w2"], params["w3"]], axis=1).astype(mxu_dtype),
        "b1": params["b1"],
        "b23": jnp.concatenate([params["b2"], params["b3"]], axis=1),
    }


if __name__ == "__main__":
    # Small shapes consistent with the module: config.batch_size=8, z_size=32.
    batch_size, input_dim, z_dim = 8, 32, 32

    key = jax.random.PRNGKey(0)
    kx, kp, ke, kxb, keb = jax.random.split(key, 5)

    x = jax.random.normal(kx, (batch_size, input_dim), dtype=jnp.float32)
    params = init_params(kp, input_dim, z_dim)
    packed_f32 = pack_params(params)
    # torch.randn([batch_size, z_size]) equivalent, drawn here for determinism.
    epsilon = jax.random.normal(ke, (batch_size, z_dim), dtype=jnp.float32)

    # Plain-JAX reference (matches the PyTorch math).
    hz_ref = jnp.tanh(x @ params["w1"] + params["b1"])
    mean_ref = hz_ref @ params["w2"] + params["b2"]
    logstd_ref = hz_ref @ params["w3"] + params["b3"]
    z_ref = mean_ref + jnp.sqrt(jnp.exp(logstd_ref)) * epsilon

    # 1) Posterior sample path (is_prior=False), f32 MXU operands.
    z, mean, logstd = z_forward(x, packed_f32, epsilon, is_prior=False)
    jax.block_until_ready((z, mean, logstd))
    assert jnp.allclose(z, z_ref, atol=1e-5)
    assert jnp.allclose(mean, mean_ref, atol=1e-5)
    assert jnp.allclose(logstd, logstd_ref, atol=1e-5)

    # 2) Prior path (is_prior=True): z == mean, no epsilon input, no z store.
    z_p, mean_p, logstd_p = z_forward(x, packed_f32, is_prior=True)
    jax.block_until_ready((z_p, mean_p, logstd_p))
    assert jnp.allclose(z_p, mean_p)
    assert jnp.allclose(mean_p, mean_ref, atol=1e-5)
    assert jnp.allclose(logstd_p, logstd_ref, atol=1e-5)

    # 3) bf16 MXU operands (v6e/v7x fast path); elementwise stays f32.
    packed_bf16 = pack_params(params, mxu_dtype=jnp.bfloat16)
    z_h, mean_h, logstd_h = z_forward(x, packed_bf16, epsilon, is_prior=False)
    jax.block_until_ready((z_h, mean_h, logstd_h))
    assert jnp.allclose(mean_h, mean_ref, atol=5e-2, rtol=5e-2)
    assert jnp.allclose(logstd_h, logstd_ref, atol=5e-2, rtol=5e-2)
    assert jnp.allclose(z_h, z_ref, atol=5e-2, rtol=5e-2)

    # 4) Batch-tiled grid path (parallel batch axis, weights resident).
    big_batch = 256
    x_big = jax.random.normal(kxb, (big_batch, input_dim), dtype=jnp.float32)
    eps_big = jax.random.normal(keb, (big_batch, z_dim), dtype=jnp.float32)
    z_b, mean_b, logstd_b = z_forward(x_big, packed_f32, eps_big, is_prior=False)
    jax.block_until_ready((z_b, mean_b, logstd_b))
    hz_b = jnp.tanh(x_big @ params["w1"] + params["b1"])
    mean_b_ref = hz_b @ params["w2"] + params["b2"]
    logstd_b_ref = hz_b @ params["w3"] + params["b3"]
    z_b_ref = mean_b_ref + jnp.sqrt(jnp.exp(logstd_b_ref)) * eps_big
    assert jnp.allclose(z_b, z_b_ref, atol=1e-5)
    assert jnp.allclose(mean_b, mean_b_ref, atol=1e-5)
    assert jnp.allclose(logstd_b, logstd_b_ref, atol=1e-5)

    print("KERNEL_OK")
</pallas_src>

<mosaic_0001>
module attributes {stable_mosaic.version = 11 : i64} {
  func.func @z_kernel(%arg0: i32, %arg1: memref<8x32xf32, #tpu.memory_space<vmem>>, %arg2: memref<32x32xf32, #tpu.memory_space<vmem>>, %arg3: memref<32x64xf32, #tpu.memory_space<vmem>>, %arg4: memref<1x32xf32, #tpu.memory_space<vmem>>, %arg5: memref<1x64xf32, #tpu.memory_space<vmem>>, %arg6: memref<8x32xf32, #tpu.memory_space<vmem>>, %arg7: memref<8x128xf32, #tpu.memory_space<vmem>>) attributes {dimension_semantics = [#tpu.dimension_semantics<parallel>], iteration_bounds = array<i64: 1>, scalar_prefetch = 0 : i64, scratch_operands = 0 : i64, tpu.core_type = #tpu.core_type<tc>, window_params = [{transform_indices = @transform_0, window_bounds = array<i64: 8, 32>}, {pipeline_mode = #tpu.pipeline_mode<synchronous>, transform_indices = @transform_1, window_bounds = array<i64: 32, 32>}, {pipeline_mode = #tpu.pipeline_mode<synchronous>, transform_indices = @transform_2, window_bounds = array<i64: 32, 64>}, {pipeline_mode = #tpu.pipeline_mode<synchronous>, transform_indices = @transform_3, window_bounds = array<i64: 1, 32>}, {pipeline_mode = #tpu.pipeline_mode<synchronous>, transform_indices = @transform_4, window_bounds = array<i64: 1, 64>}, {transform_indices = @transform_5, window_bounds = array<i64: 8, 32>}, {transform_indices = @transform_6, window_bounds = array<i64: 8, 128>}]} {
    %c0 = arith.constant 0 : index
    %c0_0 = arith.constant 0 : index
    %0 = vector.load %arg1[%c0, %c0_0] : memref<8x32xf32, #tpu.memory_space<vmem>>, vector<8x32xf32>
    %c0_1 = arith.constant 0 : index
    %c0_2 = arith.constant 0 : index
    %1 = vector.load %arg2[%c0_1, %c0_2] : memref<32x32xf32, #tpu.memory_space<vmem>>, vector<32x32xf32>
    %cst = arith.constant dense<0.000000e+00> : vector<8x32xf32>
    %2 = tpu.matmul %0, %1, %cst {dimension_numbers = #tpu.dot_dimension_numbers<[1], [0], [0], [1], [0, 0, 1, 1], [], []>} : vector<8x32xf32>, vector<32x32xf32>, vector<8x32xf32> -> vector<8x32xf32>
    %c0_3 = arith.constant 0 : index
    %c0_4 = arith.constant 0 : index
    %3 = vector.load %arg4[%c0_3, %c0_4] : memref<1x32xf32, #tpu.memory_space<vmem>>, vector<1x32xf32>
    %4 = vector.broadcast %3 : vector<1x32xf32> to vector<8x32xf32>
    %5 = arith.addf %2, %4 : vector<8x32xf32>
    %6 = math.tanh %5 : vector<8x32xf32>
    %c0_5 = arith.constant 0 : index
    %c0_6 = arith.constant 0 : index
    %7 = vector.load %arg3[%c0_5, %c0_6] : memref<32x64xf32, #tpu.memory_space<vmem>>, vector<32x64xf32>
    %cst_7 = arith.constant dense<0.000000e+00> : vector<8x64xf32>
    %8 = tpu.matmul %6, %7, %cst_7 {dimension_numbers = #tpu.dot_dimension_numbers<[1], [0], [0], [1], [0, 0, 1, 1], [], []>} : vector<8x32xf32>, vector<32x64xf32>, vector<8x64xf32> -> vector<8x64xf32>
    %c0_8 = arith.constant 0 : index
    %c0_9 = arith.constant 0 : index
    %9 = vector.load %arg5[%c0_8, %c0_9] : memref<1x64xf32, #tpu.memory_space<vmem>>, vector<1x64xf32>
    %10 = vector.broadcast %9 : vector<1x64xf32> to vector<8x64xf32>
    %11 = arith.addf %8, %10 : vector<8x64xf32>
    %c0_10 = arith.constant 0 : index
    %c0_11 = arith.constant 0 : index
    %12 = vector.load %arg7[%c0_10, %c0_11] : memref<8x128xf32, #tpu.memory_space<vmem>>, vector<8x64xf32>
    tpu.vector_store %arg7[%c0_10, %c0_11], %11 {strides = array<i32>} : memref<8x128xf32, #tpu.memory_space<vmem>>, vector<8x64xf32>,
    %13 = vector.extract_strided_slice %11 {offsets = [0, 0], sizes = [8, 32], strides = [1, 1]} : vector<8x64xf32> to vector<8x32xf32>
    %14 = vector.extract_strided_slice %11 {offsets = [0, 32], sizes = [8, 32], strides = [1, 1]} : vector<8x64xf32> to vector<8x32xf32>
    %cst_12 = arith.constant 5.000000e-01 : f32
    %15 = vector.broadcast %cst_12 : f32 to vector<8x32xf32>
    %16 = arith.mulf %15, %14 : vector<8x32xf32>
    %17 = math.exp %16 : vector<8x32xf32>
    %c0_13 = arith.constant 0 : index
    %c0_14 = arith.constant 0 : index
    %18 = vector.load %arg6[%c0_13, %c0_14] : memref<8x32xf32, #tpu.memory_space<vmem>>, vector<8x32xf32>
    %19 = arith.mulf %17, %18 : vector<8x32xf32>
    %20 = arith.addf %13, %19 : vector<8x32xf32>
    %c0_15 = arith.constant 0 : index
    %c64 = arith.constant 64 : index
    %21 = vector.load %arg7[%c0_15, %c64] : memref<8x128xf32, #tpu.memory_space<vmem>>, vector<8x32xf32>
    tpu.vector_store %arg7[%c0_15, %c64], %20 {strides = array<i32>} : memref<8x128xf32, #tpu.memory_space<vmem>>, vector<8x32xf32>,
    return
  }
  func.func @transform_0(%arg0: i32) -> (i32, i32) {
    %c0_i32 = arith.constant 0 : i32
    %c0_i32_0 = arith.constant 0 : i32
    return %arg0, %c0_i32 : i32, i32
  }
  func.func @transform_1(%arg0: i32) -> (i32, i32) {
    %c0_i32 = arith.constant 0 : i32
    %c0_i32_0 = arith.constant 0 : i32
    %c0_i32_1 = arith.constant 0 : i32
    return %c0_i32, %c0_i32_0 : i32, i32
  }
  func.func @transform_2(%arg0: i32) -> (i32, i32) {
    %c0_i32 = arith.constant 0 : i32
    %c0_i32_0 = arith.constant 0 : i32
    %c0_i32_1 = arith.constant 0 : i32
    return %c0_i32, %c0_i32_0 : i32, i32
  }
  func.func @transform_3(%arg0: i32) -> (i32, i32) {
    %c0_i32 = arith.constant 0 : i32
    %c0_i32_0 = arith.constant 0 : i32
    %c0_i32_1 = arith.constant 0 : i32
    return %c0_i32, %c0_i32_0 : i32, i32
  }
  func.func @transform_4(%arg0: i32) -> (i32, i32) {
    %c0_i32 = arith.constant 0 : i32
    %c0_i32_0 = arith.constant 0 : i32
    %c0_i32_1 = arith.constant 0 : i32
    return %c0_i32, %c0_i32_0 : i32, i32
  }
  func.func @transform_5(%arg0: i32) -> (i32, i32) {
    %c0_i32 = arith.constant 0 : i32
    %c0_i32_0 = arith.constant 0 : i32
    return %arg0, %c0_i32 : i32, i32
  }
  func.func @transform_6(%arg0: i32) -> (i32, i32) {
    %c0_i32 = arith.constant 0 : i32
    %c0_i32_0 = arith.constant 0 : i32
    return %arg0, %c0_i32 : i32, i32
  }
}

</mosaic_0001>

<bundles_post_ra>
// kernel: tpu_custom_call.1
= control target key start
LH: loop header
LB: loop body
LE: loop exit
PB: predicated region body
PF: predicated region fallthrough
CT: control target
= control target key end

     0   :  { %11 = vsyncpa [#allocation3], 0  ;;  %s403_s0 = inlined_call_operand.hbm [shape: f32[8,32], index: 0, kind: input, shape index: {}]   ;;  %s404_s1 = inlined_call_operand.hbm [shape: f32[32,32], index: 1, kind: input, shape index: {}]   ;;  %s405_s2 = inlined_call_operand.hbm [shape: f32[32,64], index: 2, kind: input, shape index: {}]   ;;  %s406_s3 = inlined_call_operand.vmem [shape: f32[1,32], index: 3, kind: input, shape index: {}]   ;;  %s407_s4 = inlined_call_operand.vmem [shape: f32[1,64], index: 4, kind: input, shape index: {}]   ;;  %s408_s5 = inlined_call_operand.hbm [shape: f32[8,32], index: 5, kind: input, shape index: {}]   ;;  %s409_s6 = inlined_call_operand.hbm [shape: f32[8,128], index: 6, kind: output, shape index: {}]  }
   0x1   :  { %12 = vsyncpa [#allocation6], 0 }
   0x2   :  { %13 = vsyncpa [#allocation9], 0  ;;  %s30_s23 = sshll.u32 %s404_s1, 4  ;;  %s31_s23 = int_to_ptr.hbm [resolvable:$true] %s30_s23 }
   0x3   :  { %14 = vsyncpa [#allocation4], 0  ;;  %s335_s24 = smov [#allocation5]   ;;  %s20_s28 = sshll.u32 %s403_s0, 4  ;;  %s21_s28 = int_to_ptr.hbm [resolvable:$true] %s20_s28 }
   0x4   :  { %s32_s25 = sshll.u32 %s335_s24, 4  ;;  %s336_s29 = smov 128   ;;  %s33_s25 = int_to_ptr.vmem [resolvable:$true] %s32_s25 }
   0x5   :  { %s337_s30 = smov 8   ;;  %s338_s7 = smov [#allocation2]  }
   0x6   :  { %38 = dma.hbm_to_vmem [thread:$0]  %s31_s23, 512, %s33_s25, [#allocation6], %s336_s29, %s336_s29, %s337_s30  }
   0x7   :  { %s22_s8 = sshll.u32 %s338_s7, 4  ;;  %s43_s11 = sshll.u32 %s405_s2, 4  ;;  %s23_s8 = int_to_ptr.vmem [resolvable:$true] %s22_s8  ;;  %s44_s11 = int_to_ptr.hbm [resolvable:$true] %s43_s11 }
   0x8   :  { %25 = dma.hbm_to_vmem [thread:$0]  %s21_s28, 128, %s23_s8, [#allocation3]  }
   0x9   :  { %s61_s13 = sshll.u32 %s408_s5, 4  ;;  %s339_s14 = smov [#allocation7]   ;;  %s62_s13 = int_to_ptr.hbm [resolvable:$true] %s61_s13 }
   0xa   :  { %s45_s15 = sshll.u32 %s339_s14, 4  ;;  %s340_s0 = smov [#allocation8]   ;;  %s46_s15 = int_to_ptr.vmem [resolvable:$true] %s45_s15 }
   0xb   :  { %51 = dma.hbm_to_vmem [thread:$0]  %s44_s11, 512, %s46_s15, [#allocation6], %s336_s29, %s336_s29, %s337_s30  }
   0xc   :  { %s63_s16 = sshll.u32 %s340_s0, 4  ;;  %s64_s16 = int_to_ptr.vmem [resolvable:$true] %s63_s16 }
   0xd   :  { %66 = dma.hbm_to_vmem [thread:$0]  %s62_s13, 128, %s64_s16, [#allocation9]  }
   0xe   :  { %327 = dma.done.wait [#allocation3], 128  }
   0xf   :  { %328 = vsyncadd [#allocation3], 4294967168 }
  0x10   :  { %329 = dma.done.wait [#allocation6], 1024  }
  0x11   :  { %330 = vsyncadd [#allocation6], 4294966272 }
  0x12   :  { %331 = dma.done.wait [#allocation9], 128  }
  0x13   :  { %332 = vsyncadd [#allocation9], 4294967168  ;;  %v87_v0 = vld [vmem:[#allocation5 + $0x18] sm:$0xff]  ;;  %v86_v1 = vld [vmem:[#allocation5 + $0x10] sm:$0xff]  ;;  %vm92_vm0 = vcmask 261120   ;;  %s341_s2 = smov 32  }
  0x14   :  { %108 = vmatpush.msra.mxu0 %v87_v0  ;;  %v85_v2 = vld [vmem:[#allocation5 + $0x8] sm:$0xff]  ;;  %v84_v3 = vld [vmem:[#allocation5] sm:$0xff]  ;;  %v83_v4 = vld [vmem:[#allocation2] sm:$0xff]  ;;  %vm148_vm1 = vcmask 523264   ;;  %s343_s20 = smov 64   ;;  %s344_s21 = smov [#allocation10]  }
  0x15   :  { %v120_v5 = vld [vmem:[#allocation7 + $0x18] sm:$0xff]  ;;  %v119_v6 = vld [vmem:[#allocation7 + $0x10] sm:$0xff]  ;;  %v118_v7 = vld [vmem:[#allocation7 + $0x8] sm:$0xff]  ;;  %s175_s22 = sshll.u32 %s344_s21, 4  ;;  %s177_s24 = sshll.u32 %s409_s6, 4  ;;  %vm168_vm2 = vcmask 785920   ;;  %s176_s22 = int_to_ptr.vmem [resolvable:$true] %s175_s22  ;;  %s178_s24 = int_to_ptr.hbm [resolvable:$true] %s177_s24 }
  0x16   :  { %109 = vmatpush.msra.mxu0 %v86_v1  ;;  %140 = vmatpush.msra.mxu1 %v120_v5  ;;  %v117_v8 = vld [vmem:[#allocation7] sm:$0xff]  ;;  %v201_v10 = vld [vmem:[%s406_s3] ss:$0 sm:$0xff]  ;;  %s342_s3 = smov 96  }
  0x17   :  { %v153_v9 = vld [vmem:[#allocation8] sm:$0xff]  ;;  %v202_v14 = vld [vmem:[%s407_s4] ss:$0 sm:$0xff] }
  0x18   :  { %110 = vmatpush.msra.mxu0 %v85_v2  ;;  %141 = vmatpush.msra.mxu1 %v119_v6 }
  0x19   :  { %155 = vrot.lane.b32.xlu0 %v153_v9, %s341_s2 }
  0x1a   :  { %111 = vmatpush.msra.mxu0 %v84_v3  ;;  %142 = vmatpush.msra.mxu1 %v118_v7 }
  0x1b   :  { %189 = vmatmul.msk.f32.vlgmr.msra.gmra.mxu0 %vm92_vm0, %v83_v4 }
  0x1c   :  { %143 = vmatpush.msra.mxu1 %v117_v8 }
  0x8b   :  { %v156_v19 = vpop.permute.xlu0 %155 }
  0x98   :  { %v113_v11 = vpop.f32.mrf.mxu0 }
  0x99   :  { %v114_v12 = vadd.f32 %v201_v10, %v113_v11 }
  0x9b   :  { %203 = vtanh.f32 %v114_v12 }
  0xa1   :  { %v204_v13 = vpop.eup %203 }
  0xa2   :  { %190 = vmatmul.msk.f32.vlgmr.msra.gmra.mxu1 %vm92_vm0, %v204_v13 }
 0x11f   :  { %v145_v15 = vpop.f32.mrf.mxu1 }
 0x120   :  { %v146_v16 = vadd.f32 %v202_v14, %v145_v15 }
 0x122   :  { %149 = vst.msk [vmem:[#allocation10] sm:$0xff] %vm148_vm1, %v146_v16  ;;  %v150_v17 = vmul.f32 0.5, %v146_v16 }
 0x124   :  { %v151_v18 = vmul.f32 1.442695, %v150_v17 }
 0x126   :  { %205 = vpow2.f32 %v151_v18 }
 0x12c   :  { %v206_v20 = vpop.eup %205 }
 0x12d   :  { %v158_v21 = vmul.f32 %v206_v20, %v156_v19 }
 0x12f   :  { %160 = vrot.lane.b32.xlu0 %v158_v21, %s342_s3 }
 0x1a1   :  { %v161_v22 = vpop.permute.xlu0 %160 }
 0x1a2   :  { %v163_v23 = vadd.f32 %v161_v22, %v146_v16 }
 0x1a4   :  { %165 = vrot.lane.b32.xlu1 %v163_v23, %s343_s20 }
 0x216   :  { %v166_v24 = vpop.permute.xlu1 %165 }
 0x217   :  { %169 = vst.msk [vmem:[#allocation10] sm:$0xff] %vm168_vm2, %v166_v24 }
 0x218   :  { %180 = dma.vmem_to_hbm [thread:$0]  %s176_s22, 128, %s178_s24, [#allocation4]  }
 0x219   :  { %333 = dma.done.wait [#allocation4], 128  }
 0x21a   :  { %334 = vsyncadd [#allocation4], 4294967168 }
 0x21b   :  { %185 = vsyncpa [#allocation3], 1 }
 0x21c   :  { %186 = vsyncpa [#allocation6], 1 }
 0x21d   :  { %187 = vsyncpa [#allocation9], 1 }
 0x21e   :  { %188 = vsyncpa [#allocation4], 1 }

</bundles_post_ra>
